<compile_context>
chip_gen: v5e
topology: v5e:2x2
jax: 0.10.0
libtpu: 0.0.40
codegen_flags: <defaults>
</compile_context>

<pallas_src>
import functools

import jax
import jax.numpy as jnp
from jax import lax
from jax.experimental import pallas as pl
from jax.experimental.pallas import tpu as pltpu

EPS = 1e-12


def _round_up(x, m):
    return (x + m - 1) // m * m


# ----------------------------------------------------------------------------
# Fused kernel:
#   w2d_ref : (Cout, Cin*kh*kw)   flattened weight (PyTorch w.view(h,-1) order)
#   w3_ref  : (kh*kw, Cout, Cin)  per-tap weight slices for the conv
#   u_ref   : (1, Cout)           left singular vector estimate
#   b_ref   : (Cout, 1)           conv bias (broadcast along lanes)
#   x_ref   : (Cin, Lin)          zero-padded, flattened channels-first input
# outputs:
#   out_ref   : (Cout, Lo)        conv output on the flattened padded grid
#   u_out_ref : (1, Cout)         updated u
#   v_out_ref : (1, Cin*kh*kw)    updated v
# ----------------------------------------------------------------------------
def _fused_sn_conv_kernel(w2d_ref, w3_ref, u_ref, b_ref, x_ref,
                          out_ref, u_out_ref, v_out_ref,
                          *, power_iterations, kh, kw, w_pad, lo):
    # ---- spectral-norm power iteration (tiny prologue) ---------------------
    w2d = w2d_ref[...].astype(jnp.float32)                    # (Cout, Kw)
    u = u_ref[...].astype(jnp.float32)                        # (1, Cout)

    v = None
    wv = None
    for _ in range(power_iterations):
        # v = l2normalize(W^T u)                              # (1, Kw)
        v = jnp.dot(u, w2d, preferred_element_type=jnp.float32)
        v = v / (jnp.sqrt(jnp.sum(v * v)) + EPS)
        # u = l2normalize(W v)   (contract on w2d axis 1 -> no transpose)
        wv = lax.dot_general(v, w2d, (((1,), (1,)), ((), ())),
                             preferred_element_type=jnp.float32)   # (1, Cout)
        u = wv / (jnp.sqrt(jnp.sum(wv * wv)) + EPS)

    sigma = jnp.sum(u * wv)          # u . (W v)
    inv_sigma = 1.0 / sigma          # exact; scalar, not on the critical path

    # ---- conv as kh*kw shifted matmuls over the flattened padded image -----
    x = x_ref[...].astype(jnp.float32)                        # (Cin, Lin)
    cout = out_ref.shape[0]
    acc = jnp.zeros((cout, lo), jnp.float32)
    for t in range(kh * kw):
        d = (t // kw) * w_pad + (t % kw)                      # static lane shift
        wt = w3_ref[t].astype(jnp.float32)                    # (Cout, Cin)
        acc = acc + jnp.dot(wt, x[:, d:d + lo],
                            preferred_element_type=jnp.float32)

    # conv(x, W/sigma) + b  ==  conv(x, W)/sigma + b
    out_ref[...] = (acc * inv_sigma
                    + b_ref[...].astype(jnp.float32)).astype(out_ref.dtype)
    u_out_ref[...] = u.astype(u_out_ref.dtype)
    v_out_ref[...] = v.astype(v_out_ref.dtype)


# ----------------------------------------------------------------------------
# Full SpectralNorm(Conv2d) forward (one pallas_call).
#   x: (N, Cin, H, W) NCHW, w: (Cout, Cin, kh, kw) OIHW, b: (Cout,)
#   u: (Cout,), v: (Cin*kh*kw,)   (v is never read when power_iterations >= 1,
#   matching the PyTorch module, which overwrites it before use.)
# ----------------------------------------------------------------------------
def spectral_norm_conv2d_forward(x, w, b, u, v, *, power_iterations=1):
    assert power_iterations >= 1
    del v  # overwritten before use in _update_u_v when power_iterations >= 1
    N, Cin, H, W = x.shape
    Cout, _, kh, kw = w.shape
    pad = kh // 2
    Hp, Wp = H + 2 * pad, W + 2 * pad
    P = Hp * Wp
    Kw = Cin * kh * kw

    lo = _round_up(N * P, 128)                    # lane-dense output length
    dmax = (kh - 1) * Wp + (kw - 1)               # max in-kernel lane shift
    lin = _round_up(lo + dmax, 128)               # padded input length

    # flattened weight (PyTorch view order) for the power iteration
    w2d = w.reshape(Cout, Kw)
    # per-tap weight slices for the conv:  w3[i*kw+j, cout, cin] = w[cout,cin,i,j]
    w3 = jnp.transpose(w, (2, 3, 0, 1)).reshape(kh * kw, Cout, Cin)

    # channels-first, spatially zero-padded, flattened activations
    xp = jnp.pad(jnp.transpose(x, (1, 0, 2, 3)),
                 ((0, 0), (0, 0), (pad, pad), (pad, pad)))     # (Cin, N, Hp, Wp)
    xf = xp.reshape(Cin, N * P)
    xe = jnp.pad(xf, ((0, 0), (0, lin - N * P)))               # (Cin, lin)

    kernel = functools.partial(_fused_sn_conv_kernel,
                               power_iterations=power_iterations,
                               kh=kh, kw=kw, w_pad=Wp, lo=lo)

    out_all, u_new, v_new = pl.pallas_call(
        kernel,
        grid=(1,),
        out_shape=(
            jax.ShapeDtypeStruct((Cout, lo), x.dtype),
            jax.ShapeDtypeStruct((1, Cout), u.dtype),
            jax.ShapeDtypeStruct((1, Kw), u.dtype),
        ),
        in_specs=[
            pl.BlockSpec((Cout, Kw), lambda i: (0, 0)),
            pl.BlockSpec((kh * kw, Cout, Cin), lambda i: (0, 0, 0)),
            pl.BlockSpec((1, Cout), lambda i: (0, 0)),
            pl.BlockSpec((Cout, 1), lambda i: (0, 0)),
            pl.BlockSpec((Cin, lin), lambda i: (0, 0)),
        ],
        out_specs=(
            pl.BlockSpec((Cout, lo), lambda i: (0, 0)),
            pl.BlockSpec((1, Cout), lambda i: (0, 0)),
            pl.BlockSpec((1, Kw), lambda i: (0, 0)),
        ),
        compiler_params=pltpu.CompilerParams(
            dimension_semantics=("arbitrary",)),
    )(w2d, w3, u.reshape(1, Cout), b.reshape(Cout, 1), xe)

    # out_all[c, n*P + h*Wp + w] is the conv result at (n, c, h, w) for h<H, w<W
    out = out_all[:, :N * P].reshape(Cout, N, Hp, Wp)[:, :, :H, :W]
    out = jnp.transpose(out, (1, 0, 2, 3))                     # back to NCHW
    return out, u_new.reshape(Cout), v_new.reshape(Kw)


if __name__ == "__main__":
    key = jax.random.PRNGKey(0)
    k_x, k_w, k_b, k_u, k_v = jax.random.split(key, 5)

    # Wrapped module: Conv2d(in=4, out=8, kernel=3, stride=1, padding=1)
    N, Cin, H, W = 2, 4, 16, 16
    Cout, kh, kw = 8, 3, 3
    height, width = Cout, Cin * kh * kw

    x = jax.random.normal(k_x, (N, Cin, H, W), dtype=jnp.float32)
    w = jax.random.normal(k_w, (Cout, Cin, kh, kw), dtype=jnp.float32) * 0.1
    b = jax.random.normal(k_b, (Cout,), dtype=jnp.float32) * 0.1

    # _make_params: u, v ~ N(0, 1), then l2-normalized
    u0 = jax.random.normal(k_u, (height,), dtype=jnp.float32)
    v0 = jax.random.normal(k_v, (width,), dtype=jnp.float32)
    u0 = u0 / (jnp.linalg.norm(u0) + EPS)
    v0 = v0 / (jnp.linalg.norm(v0) + EPS)

    out, u_new, v_new = spectral_norm_conv2d_forward(x, w, b, u0, v0,
                                                     power_iterations=1)
    jax.block_until_ready(out)

    # Pure-JAX reference for sanity checking.
    hp = lax.Precision.HIGHEST
    w2d = w.reshape(height, -1)
    v_r = jnp.matmul(w2d.T, u0, precision=hp)
    v_r = v_r / (jnp.linalg.norm(v_r) + EPS)
    u_r = jnp.matmul(w2d, v_r, precision=hp)
    u_r = u_r / (jnp.linalg.norm(u_r) + EPS)
    sigma = jnp.dot(u_r, jnp.matmul(w2d, v_r, precision=hp), precision=hp)
    w_sn_ref = w / sigma
    out_ref = lax.conv_general_dilated(
        x, w_sn_ref, window_strides=(1, 1), padding="SAME",
        dimension_numbers=("NCHW", "OIHW", "NCHW"),
        precision=hp) + b[None, :, None, None]

    assert out.shape == (N, Cout, H, W)
    assert jnp.allclose(out, out_ref, atol=2e-4, rtol=2e-4), \
        float(jnp.max(jnp.abs(out - out_ref)))
    assert jnp.allclose(u_new, u_r, atol=2e-5)
    assert jnp.allclose(v_new, v_r, atol=2e-5)

    print("KERNEL_OK")
</pallas_src>

<mosaic_0001>
module attributes {stable_mosaic.version = 11 : i64} {
  func.func @_fused_sn_conv_kernel(%arg0: i32, %arg1: memref<8x36xf32, #tpu.memory_space<vmem>>, %arg2: memref<9x8x4xf32, #tpu.memory_space<vmem>>, %arg3: memref<1x8xf32, #tpu.memory_space<vmem>>, %arg4: memref<8x1xf32, #tpu.memory_space<vmem>>, %arg5: memref<4x896xf32, #tpu.memory_space<vmem>>, %arg6: memref<8x768xf32, #tpu.memory_space<vmem>>, %arg7: memref<1x8xf32, #tpu.memory_space<vmem>>, %arg8: memref<1x36xf32, #tpu.memory_space<vmem>>) attributes {dimension_semantics = [#tpu.dimension_semantics<arbitrary>], iteration_bounds = array<i64: 1>, scalar_prefetch = 0 : i64, scratch_operands = 0 : i64, tpu.core_type = #tpu.core_type<tc>, window_params = [{pipeline_mode = #tpu.pipeline_mode<synchronous>, transform_indices = @transform_0, window_bounds = array<i64: 8, 36>}, {pipeline_mode = #tpu.pipeline_mode<synchronous>, transform_indices = @transform_1, window_bounds = array<i64: 9, 8, 4>}, {pipeline_mode = #tpu.pipeline_mode<synchronous>, transform_indices = @transform_2, window_bounds = array<i64: 1, 8>}, {pipeline_mode = #tpu.pipeline_mode<synchronous>, transform_indices = @transform_3, window_bounds = array<i64: 8, 1>}, {pipeline_mode = #tpu.pipeline_mode<synchronous>, transform_indices = @transform_4, window_bounds = array<i64: 4, 896>}, {pipeline_mode = #tpu.pipeline_mode<synchronous>, transform_indices = @transform_5, window_bounds = array<i64: 8, 768>}, {pipeline_mode = #tpu.pipeline_mode<synchronous>, transform_indices = @transform_6, window_bounds = array<i64: 1, 8>}, {pipeline_mode = #tpu.pipeline_mode<synchronous>, transform_indices = @transform_7, window_bounds = array<i64: 1, 36>}]} {
    %c0 = arith.constant 0 : index
    %c0_0 = arith.constant 0 : index
    %0 = vector.load %arg1[%c0, %c0_0] : memref<8x36xf32, #tpu.memory_space<vmem>>, vector<8x36xf32>
    %c0_1 = arith.constant 0 : index
    %c0_2 = arith.constant 0 : index
    %1 = vector.load %arg3[%c0_1, %c0_2] : memref<1x8xf32, #tpu.memory_space<vmem>>, vector<1x8xf32>
    %cst = arith.constant dense<0.000000e+00> : vector<1x36xf32>
    %2 = tpu.matmul %1, %0, %cst {dimension_numbers = #tpu.dot_dimension_numbers<[1], [0], [0], [1], [0, 0, 1, 1], [], []>} : vector<1x8xf32>, vector<8x36xf32>, vector<1x36xf32> -> vector<1x36xf32>
    %3 = arith.mulf %2, %2 : vector<1x36xf32>
    %4 = vector.shape_cast %3 : vector<1x36xf32> to vector<1x1x36xf32>
    %cst_3 = arith.constant dense<0.000000e+00> : vector<1xf32>
    %5 = vector.multi_reduction <add>, %4, %cst_3 [1, 2] : vector<1x1x36xf32> to vector<1xf32>
    %6 = vector.shape_cast %5 : vector<1xf32> to vector<1x1x1xf32>
    %7 = vector.extract %6[0, 0, 0] : f32 from vector<1x1x1xf32>
    %8 = math.sqrt %7 : f32
    %cst_4 = arith.constant 9.99999996E-13 : f32
    %9 = arith.addf %8, %cst_4 : f32
    %10 = vector.broadcast %9 : f32 to vector<1x36xf32>
    %11 = arith.divf %2, %10 : vector<1x36xf32>
    %cst_5 = arith.constant dense<0.000000e+00> : vector<1x8xf32>
    %12 = tpu.matmul %11, %0, %cst_5 {dimension_numbers = #tpu.dot_dimension_numbers<[1], [1], [0], [0], [0, 0, 1, 0], [], []>} : vector<1x36xf32>, vector<8x36xf32>, vector<1x8xf32> -> vector<1x8xf32>
    %13 = arith.mulf %12, %12 : vector<1x8xf32>
    %14 = vector.shape_cast %13 : vector<1x8xf32> to vector<1x1x8xf32>
    %cst_6 = arith.constant dense<0.000000e+00> : vector<1xf32>
    %15 = vector.multi_reduction <add>, %14, %cst_6 [1, 2] : vector<1x1x8xf32> to vector<1xf32>
    %16 = vector.shape_cast %15 : vector<1xf32> to vector<1x1x1xf32>
    %17 = vector.extract %16[0, 0, 0] : f32 from vector<1x1x1xf32>
    %18 = math.sqrt %17 : f32
    %cst_7 = arith.constant 9.99999996E-13 : f32
    %19 = arith.addf %18, %cst_7 : f32
    %20 = vector.broadcast %19 : f32 to vector<1x8xf32>
    %21 = arith.divf %12, %20 : vector<1x8xf32>
    %22 = arith.mulf %21, %12 : vector<1x8xf32>
    %23 = vector.shape_cast %22 : vector<1x8xf32> to vector<1x1x8xf32>
    %cst_8 = arith.constant dense<0.000000e+00> : vector<1xf32>
    %24 = vector.multi_reduction <add>, %23, %cst_8 [1, 2] : vector<1x1x8xf32> to vector<1xf32>
    %25 = vector.shape_cast %24 : vector<1xf32> to vector<1x1x1xf32>
    %26 = vector.extract %25[0, 0, 0] : f32 from vector<1x1x1xf32>
    %cst_9 = arith.constant 1.000000e+00 : f32
    %27 = arith.divf %cst_9, %26 : f32
    %c0_10 = arith.constant 0 : index
    %c0_11 = arith.constant 0 : index
    %28 = vector.load %arg5[%c0_10, %c0_11] : memref<4x896xf32, #tpu.memory_space<vmem>>, vector<4x896xf32>
    %cst_12 = arith.constant 0.000000e+00 : f32
    %29 = vector.broadcast %cst_12 : f32 to vector<8x768xf32>
    %c0_13 = arith.constant 0 : index
    %c0_14 = arith.constant 0 : index
    %c0_15 = arith.constant 0 : index
    %30 = vector.load %arg2[%c0_13, %c0_14, %c0_15] : memref<9x8x4xf32, #tpu.memory_space<vmem>>, vector<1x8x4xf32>
    %31 = vector.shape_cast %30 : vector<1x8x4xf32> to vector<8x4xf32>
    %32 = vector.extract_strided_slice %28 {offsets = [0, 0], sizes = [4, 768], strides = [1, 1]} : vector<4x896xf32> to vector<4x768xf32>
    %cst_16 = arith.constant dense<0.000000e+00> : vector<8x768xf32>
    %33 = tpu.matmul %31, %32, %cst_16 {dimension_numbers = #tpu.dot_dimension_numbers<[1], [0], [0], [1], [0, 0, 1, 1], [], []>} : vector<8x4xf32>, vector<4x768xf32>, vector<8x768xf32> -> vector<8x768xf32>
    %34 = arith.addf %29, %33 : vector<8x768xf32>
    %c1 = arith.constant 1 : index
    %c0_17 = arith.constant 0 : index
    %c0_18 = arith.constant 0 : index
    %35 = vector.load %arg2[%c1, %c0_17, %c0_18] : memref<9x8x4xf32, #tpu.memory_space<vmem>>, vector<1x8x4xf32>
    %36 = vector.shape_cast %35 : vector<1x8x4xf32> to vector<8x4xf32>
    %37 = vector.extract_strided_slice %28 {offsets = [0, 1], sizes = [4, 768], strides = [1, 1]} : vector<4x896xf32> to vector<4x768xf32>
    %cst_19 = arith.constant dense<0.000000e+00> : vector<8x768xf32>
    %38 = tpu.matmul %36, %37, %cst_19 {dimension_numbers = #tpu.dot_dimension_numbers<[1], [0], [0], [1], [0, 0, 1, 1], [], []>} : vector<8x4xf32>, vector<4x768xf32>, vector<8x768xf32> -> vector<8x768xf32>
    %39 = arith.addf %34, %38 : vector<8x768xf32>
    %c2 = arith.constant 2 : index
    %c0_20 = arith.constant 0 : index
    %c0_21 = arith.constant 0 : index
    %40 = vector.load %arg2[%c2, %c0_20, %c0_21] : memref<9x8x4xf32, #tpu.memory_space<vmem>>, vector<1x8x4xf32>
    %41 = vector.shape_cast %40 : vector<1x8x4xf32> to vector<8x4xf32>
    %42 = vector.extract_strided_slice %28 {offsets = [0, 2], sizes = [4, 768], strides = [1, 1]} : vector<4x896xf32> to vector<4x768xf32>
    %cst_22 = arith.constant dense<0.000000e+00> : vector<8x768xf32>
    %43 = tpu.matmul %41, %42, %cst_22 {dimension_numbers = #tpu.dot_dimension_numbers<[1], [0], [0], [1], [0, 0, 1, 1], [], []>} : vector<8x4xf32>, vector<4x768xf32>, vector<8x768xf32> -> vector<8x768xf32>
    %44 = arith.addf %39, %43 : vector<8x768xf32>
    %c3 = arith.constant 3 : index
    %c0_23 = arith.constant 0 : index
    %c0_24 = arith.constant 0 : index
    %45 = vector.load %arg2[%c3, %c0_23, %c0_24] : memref<9x8x4xf32, #tpu.memory_space<vmem>>, vector<1x8x4xf32>
    %46 = vector.shape_cast %45 : vector<1x8x4xf32> to vector<8x4xf32>
    %47 = vector.extract_strided_slice %28 {offsets = [0, 18], sizes = [4, 768], strides = [1, 1]} : vector<4x896xf32> to vector<4x768xf32>
    %cst_25 = arith.constant dense<0.000000e+00> : vector<8x768xf32>
    %48 = tpu.matmul %46, %47, %cst_25 {dimension_numbers = #tpu.dot_dimension_numbers<[1], [0], [0], [1], [0, 0, 1, 1], [], []>} : vector<8x4xf32>, vector<4x768xf32>, vector<8x768xf32> -> vector<8x768xf32>
    %49 = arith.addf %44, %48 : vector<8x768xf32>
    %c4 = arith.constant 4 : index
    %c0_26 = arith.constant 0 : index
    %c0_27 = arith.constant 0 : index
    %50 = vector.load %arg2[%c4, %c0_26, %c0_27] : memref<9x8x4xf32, #tpu.memory_space<vmem>>, vector<1x8x4xf32>
    %51 = vector.shape_cast %50 : vector<1x8x4xf32> to vector<8x4xf32>
    %52 = vector.extract_strided_slice %28 {offsets = [0, 19], sizes = [4, 768], strides = [1, 1]} : vector<4x896xf32> to vector<4x768xf32>
    %cst_28 = arith.constant dense<0.000000e+00> : vector<8x768xf32>
    %53 = tpu.matmul %51, %52, %cst_28 {dimension_numbers = #tpu.dot_dimension_numbers<[1], [0], [0], [1], [0, 0, 1, 1], [], []>} : vector<8x4xf32>, vector<4x768xf32>, vector<8x768xf32> -> vector<8x768xf32>
    %54 = arith.addf %49, %53 : vector<8x768xf32>
    %c5 = arith.constant 5 : index
    %c0_29 = arith.constant 0 : index
    %c0_30 = arith.constant 0 : index
    %55 = vector.load %arg2[%c5, %c0_29, %c0_30] : memref<9x8x4xf32, #tpu.memory_space<vmem>>, vector<1x8x4xf32>
    %56 = vector.shape_cast %55 : vector<1x8x4xf32> to vector<8x4xf32>
    %57 = vector.extract_strided_slice %28 {offsets = [0, 20], sizes = [4, 768], strides = [1, 1]} : vector<4x896xf32> to vector<4x768xf32>
    %cst_31 = arith.constant dense<0.000000e+00> : vector<8x768xf32>
    %58 = tpu.matmul %56, %57, %cst_31 {dimension_numbers = #tpu.dot_dimension_numbers<[1], [0], [0], [1], [0, 0, 1, 1], [], []>} : vector<8x4xf32>, vector<4x768xf32>, vector<8x768xf32> -> vector<8x768xf32>
    %59 = arith.addf %54, %58 : vector<8x768xf32>
    %c6 = arith.constant 6 : index
    %c0_32 = arith.constant 0 : index
    %c0_33 = arith.constant 0 : index
    %60 = vector.load %arg2[%c6, %c0_32, %c0_33] : memref<9x8x4xf32, #tpu.memory_space<vmem>>, vector<1x8x4xf32>
    %61 = vector.shape_cast %60 : vector<1x8x4xf32> to vector<8x4xf32>
    %62 = vector.extract_strided_slice %28 {offsets = [0, 36], sizes = [4, 768], strides = [1, 1]} : vector<4x896xf32> to vector<4x768xf32>
    %cst_34 = arith.constant dense<0.000000e+00> : vector<8x768xf32>
    %63 = tpu.matmul %61, %62, %cst_34 {dimension_numbers = #tpu.dot_dimension_numbers<[1], [0], [0], [1], [0, 0, 1, 1], [], []>} : vector<8x4xf32>, vector<4x768xf32>, vector<8x768xf32> -> vector<8x768xf32>
    %64 = arith.addf %59, %63 : vector<8x768xf32>
    %c7 = arith.constant 7 : index
    %c0_35 = arith.constant 0 : index
    %c0_36 = arith.constant 0 : index
    %65 = vector.load %arg2[%c7, %c0_35, %c0_36] : memref<9x8x4xf32, #tpu.memory_space<vmem>>, vector<1x8x4xf32>
    %66 = vector.shape_cast %65 : vector<1x8x4xf32> to vector<8x4xf32>
    %67 = vector.extract_strided_slice %28 {offsets = [0, 37], sizes = [4, 768], strides = [1, 1]} : vector<4x896xf32> to vector<4x768xf32>
    %cst_37 = arith.constant dense<0.000000e+00> : vector<8x768xf32>
    %68 = tpu.matmul %66, %67, %cst_37 {dimension_numbers = #tpu.dot_dimension_numbers<[1], [0], [0], [1], [0, 0, 1, 1], [], []>} : vector<8x4xf32>, vector<4x768xf32>, vector<8x768xf32> -> vector<8x768xf32>
    %69 = arith.addf %64, %68 : vector<8x768xf32>
    %c8 = arith.constant 8 : index
    %c0_38 = arith.constant 0 : index
    %c0_39 = arith.constant 0 : index
    %70 = vector.load %arg2[%c8, %c0_38, %c0_39] : memref<9x8x4xf32, #tpu.memory_space<vmem>>, vector<1x8x4xf32>
    %71 = vector.shape_cast %70 : vector<1x8x4xf32> to vector<8x4xf32>
    %72 = vector.extract_strided_slice %28 {offsets = [0, 38], sizes = [4, 768], strides = [1, 1]} : vector<4x896xf32> to vector<4x768xf32>
    %cst_40 = arith.constant dense<0.000000e+00> : vector<8x768xf32>
    %73 = tpu.matmul %71, %72, %cst_40 {dimension_numbers = #tpu.dot_dimension_numbers<[1], [0], [0], [1], [0, 0, 1, 1], [], []>} : vector<8x4xf32>, vector<4x768xf32>, vector<8x768xf32> -> vector<8x768xf32>
    %74 = arith.addf %69, %73 : vector<8x768xf32>
    %75 = vector.broadcast %27 : f32 to vector<8x768xf32>
    %76 = arith.mulf %74, %75 : vector<8x768xf32>
    %c0_41 = arith.constant 0 : index
    %c0_42 = arith.constant 0 : index
    %77 = vector.load %arg4[%c0_41, %c0_42] : memref<8x1xf32, #tpu.memory_space<vmem>>, vector<8x1xf32>
    %78 = vector.broadcast %77 : vector<8x1xf32> to vector<8x768xf32>
    %79 = arith.addf %76, %78 : vector<8x768xf32>
    %c0_43 = arith.constant 0 : index
    %c0_44 = arith.constant 0 : index
    %80 = vector.load %arg6[%c0_43, %c0_44] : memref<8x768xf32, #tpu.memory_space<vmem>>, vector<8x768xf32>
    tpu.vector_store %arg6[%c0_43, %c0_44], %79 {strides = array<i32>} : memref<8x768xf32, #tpu.memory_space<vmem>>, vector<8x768xf32>,
    %c0_45 = arith.constant 0 : index
    %c0_46 = arith.constant 0 : index
    %81 = vector.load %arg7[%c0_45, %c0_46] : memref<1x8xf32, #tpu.memory_space<vmem>>, vector<1x8xf32>
    tpu.vector_store %arg7[%c0_45, %c0_46], %21 {strides = array<i32>} : memref<1x8xf32, #tpu.memory_space<vmem>>, vector<1x8xf32>,
    %c0_47 = arith.constant 0 : index
    %c0_48 = arith.constant 0 : index
    %82 = vector.load %arg8[%c0_47, %c0_48] : memref<1x36xf32, #tpu.memory_space<vmem>>, vector<1x36xf32>
    tpu.vector_store %arg8[%c0_47, %c0_48], %11 {strides = array<i32>} : memref<1x36xf32, #tpu.memory_space<vmem>>, vector<1x36xf32>,
    return
  }
  func.func @transform_0(%arg0: i32) -> (i32, i32) {
    %c0_i32 = arith.constant 0 : i32
    %c0_i32_0 = arith.constant 0 : i32
    %c0_i32_1 = arith.constant 0 : i32
    return %c0_i32, %c0_i32_0 : i32, i32
  }
  func.func @transform_1(%arg0: i32) -> (i32, i32, i32) {
    %c0_i32 = arith.constant 0 : i32
    %c0_i32_0 = arith.constant 0 : i32
    %c0_i32_1 = arith.constant 0 : i32
    %c0_i32_2 = arith.constant 0 : i32
    return %c0_i32, %c0_i32_0, %c0_i32_1 : i32, i32, i32
  }
  func.func @transform_2(%arg0: i32) -> (i32, i32) {
    %c0_i32 = arith.constant 0 : i32
    %c0_i32_0 = arith.constant 0 : i32
    %c0_i32_1 = arith.constant 0 : i32
    return %c0_i32, %c0_i32_0 : i32, i32
  }
  func.func @transform_3(%arg0: i32) -> (i32, i32) {
    %c0_i32 = arith.constant 0 : i32
    %c0_i32_0 = arith.constant 0 : i32
    %c0_i32_1 = arith.constant 0 : i32
    return %c0_i32, %c0_i32_0 : i32, i32
  }
  func.func @transform_4(%arg0: i32) -> (i32, i32) {
    %c0_i32 = arith.constant 0 : i32
    %c0_i32_0 = arith.constant 0 : i32
    %c0_i32_1 = arith.constant 0 : i32
    return %c0_i32, %c0_i32_0 : i32, i32
  }
  func.func @transform_5(%arg0: i32) -> (i32, i32) {
    %c0_i32 = arith.constant 0 : i32
    %c0_i32_0 = arith.constant 0 : i32
    %c0_i32_1 = arith.constant 0 : i32
    return %c0_i32, %c0_i32_0 : i32, i32
  }
  func.func @transform_6(%arg0: i32) -> (i32, i32) {
    %c0_i32 = arith.constant 0 : i32
    %c0_i32_0 = arith.constant 0 : i32
    %c0_i32_1 = arith.constant 0 : i32
    return %c0_i32, %c0_i32_0 : i32, i32
  }
  func.func @transform_7(%arg0: i32) -> (i32, i32) {
    %c0_i32 = arith.constant 0 : i32
    %c0_i32_0 = arith.constant 0 : i32
    %c0_i32_1 = arith.constant 0 : i32
    return %c0_i32, %c0_i32_0 : i32, i32
  }
}

</mosaic_0001>

<bundles_post_ra>
// kernel: tpu_custom_call.1
= control target key start
LH: loop header
LB: loop body
LE: loop exit
PB: predicated region body
PF: predicated region fallthrough
CT: control target
= control target key end

     0   :  { %13 = vsyncpa [#allocation3], 0  ;;  %vm27_vm0 = vcmask 64512   ;;  %s2470_s0 = inlined_call_operand.vmem [shape: f32[8,36], index: 0, kind: input, shape index: {}]   ;;  %s2471_s1 = inlined_call_operand.vmem [shape: f32[9,8,4], index: 1, kind: input, shape index: {}]   ;;  %s2472_s2 = inlined_call_operand.vmem [shape: f32[1,8], index: 2, kind: input, shape index: {}]   ;;  %s2473_s3 = inlined_call_operand.vmem [shape: f32[8,1], index: 3, kind: input, shape index: {}]   ;;  %s2474_s4 = inlined_call_operand.vmem [shape: f32[4,896], index: 4, kind: input, shape index: {}]   ;;  %s2475_s5 = inlined_call_operand.hbm [shape: f32[8,768], index: 5, kind: output, shape index: {0}]   ;;  %s2476_s6 = inlined_call_operand.hbm [shape: f32[1,8], index: 6, kind: output, shape index: {1}]   ;;  %s2477_s7 = inlined_call_operand.hbm [shape: f32[1,36], index: 7, kind: output, shape index: {2}]  }
   0x1   :  { %v25_v0 = vld [vmem:[%s2470_s0] sm:$0xff] }
   0x2   :  { %v26_v1 = vld [vmem:[%s2472_s2] sm:$0x1] }
   0x3   :  { %14 = vsyncpa [#allocation5], 0  ;;  %46 = vmatpush.msra.mxu0 %v25_v0  ;;  %vm52_vm1 = vcmask 286720   ;;  %vm94_vm4 = vcmask 293888   ;;  %v2136_v35 = vld [vmem:[%s2474_s4] sm:$0xff]  ;;  %v2141_v36 = vld [vmem:[%s2474_s4 + $0x10] sm:$0xff] }
   0x4   :  { %1840 = vmatmul.msk.f32.vlgmr.msra.gmra.mxu0 %vm27_vm0, %v26_v1  ;;  %1841 = vmatpush.xpose.msk.msra.mxu1 %vm94_vm4, %v25_v0  ;;  %202 = vst [vmem:[#allocation1] ss:$2 sm:$0xff] %v2136_v35  ;;  %s2071_s10 = smov 127   ;;  %v2162_v45 = vld [vmem:[%s2474_s4 + $0x8] sm:$0xff]  ;;  %vm122_vm9 = vcmask 57344   ;;  %s2072_s13 = smov 126  }
   0x5   :  { %206 = vst [vmem:[#allocation1 + $0x20] ss:$2 sm:$0xff] %v2141_v36  ;;  %v2185_v58 = vld [vmem:[%s2474_s4 + $0x18] sm:$0xf]  ;;  %s2073_s4 = smov 110   ;;  %s2074_s16 = smov 109  }
   0x6   :  { %204 = vst [vmem:[#allocation1 + $0x10] ss:$2 sm:$0xff] %v2162_v45  ;;  %s2075_s17 = smov 108   ;;  %s2076_s18 = smov 92   ;;  %vm230_vm10 = vcmask 1039360   ;;  %vm241_vm11 = vcmask 1043456  }
   0x7   :  { %208 = vst [vmem:[#allocation1 + $0x30] ss:$2 sm:$0xff] %v2185_v58  ;;  %s2077_s19 = smov 91   ;;  %s2078_s20 = smov 90   ;;  %vm237_vm12 = vcmask 31744   ;;  %vm550_vm13 = vcmask 1031168  }
   0x8   :  { %vm728_vm14 = vcmask 900096   ;;  %vm906_vm15 = vcmask 891904   ;;  %s1811_s21 = sshll.u32 %s2476_s6, 4  ;;  %s2082_s26 = smov [#allocation2]   ;;  %s1812_s21 = int_to_ptr.hbm [resolvable:$true] %s1811_s21 }
   0x9   :  { %s1798_s27 = sshll.u32 %s2082_s26, 4  ;;  %s1799_s27 = int_to_ptr.vmem [resolvable:$true] %s1798_s27 }
   0xb   :  { %v209_v37 = vld.sshfl [vmem:[#allocation1] sm:$0xff pattern:$0x75316420]  ;;  %v210_v38 = vld.sshfl [vmem:[#allocation1 + $0x8] sm:$0xff pattern:$0x75316420] }
   0xc   :  { %216 = vrot.lane.b32.xlu1 %v209_v37, %s2071_s10  ;;  %374 = vst [vmem:[#allocation1] ss:$2 sm:$0xff] %v2136_v35  ;;  %v214_v39 = vld.sshfl [vmem:[#allocation1 + $0x28] sm:$0xff pattern:$0x75316420] }
   0xd   :  { %v213_v40 = vld.sshfl [vmem:[#allocation1 + $0x20] sm:$0xff pattern:$0x75316420]  ;;  %v211_v50 = vld.sshfl [vmem:[#allocation1 + $0x10] sm:$0xff pattern:$0x75316420] }
   0xe   :  { %378 = vst [vmem:[#allocation1 + $0x20] ss:$2 sm:$0xff] %v2141_v36  ;;  %v212_v51 = vld.sshfl [vmem:[#allocation1 + $0x18] sm:$0xff pattern:$0x75316420]  ;;  %220 = vrot.lane.b32.xlu2 %v211_v50, %s2071_s10 }
   0xf   :  { %376 = vst [vmem:[#allocation1 + $0x10] ss:$2 sm:$0xff] %v2162_v45  ;;  %v215_v62 = vld.sshfl [vmem:[#allocation1 + $0x30] sm:$0xff pattern:$0x75316420] }
  0x10   :  { %528 = vst [vmem:[#allocation1 + $0x30] ss:$2 sm:$0xff] %v2185_v58 }
  0x13   :  { %v2148_v41 = vld.sshfl [vmem:[#allocation1] sm:$0xff pattern:$0x75316420]  ;;  %v2150_v42 = vld.sshfl [vmem:[#allocation1 + $0x8] sm:$0xff pattern:$0x75316420] }
  0x14   :  { %218 = vrot.lane.b32.xlu1 %v210_v38, %s2071_s10  ;;  %522 = vst [vmem:[#allocation1] ss:$2 sm:$0xff] %v2136_v35 }
  0x15   :  { %v2154_v43 = vld.sshfl [vmem:[#allocation1 + $0x20] sm:$0xff pattern:$0x75316420]  ;;  %v2156_v44 = vld.sshfl [vmem:[#allocation1 + $0x28] sm:$0xff pattern:$0x75316420] }
  0x16   :  { %526 = vst [vmem:[#allocation1 + $0x20] ss:$2 sm:$0xff] %v2141_v36  ;;  %v2176_v55 = vld.sshfl [vmem:[#allocation1 + $0x10] sm:$0xff pattern:$0x75316420]  ;;  %222 = vrot.lane.b32.xlu2 %v212_v51, %s2071_s10 }
  0x17   :  { %v2178_v56 = vld.sshfl [vmem:[#allocation1 + $0x18] sm:$0xff pattern:$0x75316420] }
  0x18   :  { %524 = vst [vmem:[#allocation1 + $0x10] ss:$2 sm:$0xff] %v2162_v45 }
  0x1b   :  { %v529_v46 = vld.sshfl [vmem:[#allocation1] sm:$0xff pattern:$0x75316420]  ;;  %v530_v47 = vld.sshfl [vmem:[#allocation1 + $0x8] sm:$0xff pattern:$0x75316420] }
  0x1c   :  { %226 = vrot.lane.b32.xlu1 %v214_v39, %s2071_s10  ;;  %700 = vst [vmem:[#allocation1] ss:$2 sm:$0xff] %v2136_v35 }
  0x1d   :  { %v533_v48 = vld.sshfl [vmem:[#allocation1 + $0x20] sm:$0xff pattern:$0x75316420]  ;;  %v534_v53 = vld.sshfl [vmem:[#allocation1 + $0x28] sm:$0xff pattern:$0x75316420] }
  0x1e   :  { %704 = vst [vmem:[#allocation1 + $0x20] ss:$2 sm:$0xff] %v2141_v36  ;;  %228 = vrot.lane.b32.xlu2 %v215_v62, %s2071_s10 }
  0x1f   :  { %v531_v60 = vld.sshfl [vmem:[#allocation1 + $0x10] sm:$0xff pattern:$0x75316420]  ;;  %v532_v61 = vld.sshfl [vmem:[#allocation1 + $0x18] sm:$0xff pattern:$0x75316420] }
  0x20   :  { %702 = vst [vmem:[#allocation1 + $0x10] ss:$2 sm:$0xff] %v2162_v45 }
  0x23   :  { %v708_v57 = vld.sshfl [vmem:[#allocation1 + $0x8] sm:$0xff pattern:$0x75316420]  ;;  %v707_v59 = vld.sshfl [vmem:[#allocation1] sm:$0xff pattern:$0x75316420] }
  0x24   :  { %536 = vrot.lane.b32.xlu1 %v529_v46, %s2072_s13  ;;  %878 = vst [vmem:[#allocation1] ss:$2 sm:$0xff] %v2136_v35 }
  0x25   :  { %v711_v63 = vld.sshfl [vmem:[#allocation1 + $0x20] sm:$0xff pattern:$0x75316420]  ;;  %v712_v0 = vld.sshfl [vmem:[#allocation1 + $0x28] sm:$0xff pattern:$0x75316420] }
  0x26   :  { %882 = vst [vmem:[#allocation1 + $0x20] ss:$2 sm:$0xff] %v2141_v36  ;;  %538 = vrot.lane.b32.xlu2 %v530_v47, %s2072_s13 }
  0x27   :  { %v709_v1 = vld.sshfl [vmem:[#allocation1 + $0x10] sm:$0xff pattern:$0x75316420] }
  0x2c   :  { %540 = vrot.lane.b32.xlu1 %v531_v60, %s2072_s13 }
  0x2e   :  { %542 = vrot.lane.b32.xlu2 %v532_v61, %s2072_s13 }
  0x34   :  { %546 = vrot.lane.b32.xlu1 %v534_v53, %s2072_s13 }
  0x3c   :  { %718 = vrot.lane.b32.xlu1 %v709_v1, %s2073_s4 }
  0x44   :  { %722 = vrot.lane.b32.xlu1 %v711_v63, %s2073_s4 }
  0x81   :  { %v48_v2 = vpop.f32.mrf.mxu0 }
  0x82   :  { %v51_v3 = vmul.f32 %v48_v2, %v48_v2 }
  0x84   :  { %v53_v4 = vsel %vm52_vm1, %v51_v3, 0.0  ;;  %v535_v3 = vld.sshfl [vmem:[#allocation1 + $0x30] sm:$0xff pattern:$0x75316420] }
  0x85   :  { %54 = vadd.xlane.f32.xlu0 %v53_v4  ;;  %706 = vst [vmem:[#allocation1 + $0x30] ss:$2 sm:$0xff] %v2185_v58  ;;  %v889_v4 = vld.sshfl [vmem:[#allocation1 + $0x20] sm:$0xff pattern:$0x75316420]  ;;  %548 = vrot.lane.b32.xlu2 %v535_v3, %s2072_s13 }
  0xf8   :  { %v55_v5 = vpop.xlane.xlu0 %54 }
  0xf9   :  { %v56_v6 = vrot.slane %v55_v5, 4 }
  0xfb   :  { %v57_v7 = vadd.f32 %v56_v6, %v55_v5 }
  0xfd   :  { %v58_v8 = vrot.slane %v57_v7, 2 }
  0xff   :  { %v59_v9 = vadd.f32 %v58_v8, %v57_v7  ;;  %v713_v7 = vld.sshfl [vmem:[#allocation1 + $0x30] sm:$0xff pattern:$0x75316420]  ;;  %v890_v8 = vld.sshfl [vmem:[#allocation1 + $0x28] sm:$0xff pattern:$0x75316420] }
 0x100   :  { %884 = vst [vmem:[#allocation1 + $0x30] ss:$2 sm:$0xff] %v2185_v58 }
 0x101   :  { %v60_v10 = vrot.slane %v59_v9, 1  ;;  %1060 = vst [vmem:[#allocation1 + $0x20] ss:$2 sm:$0xff] %v2141_v36 }
 0x103   :  { %v61_v11 = vadd.f32 %v60_v10, %v59_v9  ;;  %v885_v9 = vld.sshfl [vmem:[#allocation1] sm:$0xff pattern:$0x75316420] }
 0x104   :  { %892 = vrot.lane.b32.xlu1 %v885_v9, %s2074_s16 }
 0x105   :  { %1959 = vpush %v61_v11 }
 0x107   :  { %v891_v10 = vld.sshfl [vmem:[#allocation1 + $0x30] sm:$0xff pattern:$0x75316420] }
 0x108   :  { %1062 = vst [vmem:[#allocation1 + $0x30] ss:$2 sm:$0xff] %v2185_v58 }
 0x136   :  { %s1960_s0 = spop %1959 }
 0x137   :  { %v63_v12 = vstv %s1960_s0 }
 0x138   :  { %1985 = vrsqrt.f32 %v63_v12  ;;  %vm71_vm2 = vcmp.eq.f32.partialorder %v63_v12, inf  ;;  %v74_v20 = vand.u32 2147483648, %v63_v12  ;;  %vm73_vm3 = vcmp.eq.f32.partialorder %v63_v12, 0.0 }
 0x13e   :  { %v1986_v13 = vpop.eup %1985 }
 0x13f   :  { %v65_v14 = vmul.f32 %v1986_v13, %v63_v12 }
 0x141   :  { %v66_v15 = vmul.f32 %v1986_v13, %v65_v14  ;;  %v1069_v14 = vld.sshfl [vmem:[#allocation1 + $0x30] sm:$0xff pattern:$0x75316420] }
 0x142   :  { %1240 = vst [vmem:[#allocation1 + $0x30] ss:$2 sm:$0xff] %v2185_v58 }
 0x143   :  { %v67_v16 = vmul.f32 0.5, %v66_v15  ;;  %v1067_v15 = vld.sshfl [vmem:[#allocation1 + $0x20] sm:$0xff pattern:$0x75316420] }
 0x145   :  { %v68_v17 = vsub.f32 1.5, %v67_v16  ;;  %v1068_v16 = vld.sshfl [vmem:[#allocation1 + $0x28] sm:$0xff pattern:$0x75316420] }
 0x146   :  { %1238 = vst [vmem:[#allocation1 + $0x20] ss:$2 sm:$0xff] %v2141_v36 }
 0x147   :  { %v69_v18 = vmul.f32 %v1986_v13, %v68_v17  ;;  %v886_v13 = vld.sshfl [vmem:[#allocation1 + $0x8] sm:$0xff pattern:$0x75316420] }
 0x148   :  { %1056 = vst [vmem:[#allocation1] ss:$2 sm:$0xff] %v2136_v35 }
 0x149   :  { %v70_v19 = vmul.f32 %v69_v18, %v63_v12 }
 0x14b   :  { %v72_v21 = vsel %vm71_vm2, %v63_v12, %v70_v19  ;;  %vm1084_vm2 = vcmask 883712  }
 0x14c   :  { %v75_v22 = vsel %vm73_vm3, %v74_v20, %v72_v21  ;;  %v1247_v21 = vld.sshfl [vmem:[#allocation1 + $0x30] sm:$0xff pattern:$0x75316420]  ;;  %vm1262_vm3 = vcmask 752640  }
 0x14d   :  { %1961 = vpush %v75_v22  ;;  %v1245_v22 = vld.sshfl [vmem:[#allocation1 + $0x20] sm:$0xff pattern:$0x75316420] }
 0x14e   :  { %1418 = vst [vmem:[#allocation1 + $0x30] ss:$2 sm:$0xff] %v2185_v58 }
 0x14f   :  { %v1063_v18 = vld.sshfl [vmem:[#allocation1] sm:$0xff pattern:$0x75316420]  ;;  %v1064_v19 = vld.sshfl [vmem:[#allocation1 + $0x8] sm:$0xff pattern:$0x75316420] }
 0x150   :  { %1234 = vst [vmem:[#allocation1] ss:$2 sm:$0xff] %v2136_v35 }
 0x17e   :  { %s1962_s2 = spop %1961 }
 0x17f   :  { %s77_s28 = sadd.f32 1e-12, %s1962_s2 }
 0x181   :  { %v78_v23 = vstv %s77_s28  ;;  %s1800_s28 = sshll.u32 %s2475_s5, 4  ;;  %s1801_s28 = int_to_ptr.hbm [resolvable:$true] %s1800_s28 }
 0x182   :  { %1987 = vrcp.f32 %v78_v23  ;;  %v90_v27 = vand.u32 2147483648, %v78_v23  ;;  %v88_v29 = vand.u32 2147483647, %v78_v23  ;;  %vm84_vm6 = vweird.f32 %v78_v23 }
 0x184   :  { %v91_v31 = vor.u32 1.1754944e-38, %v90_v27  ;;  %vm89_vm8 = vcmp.eq.f32.partialorder %v88_v29, 8.507059e+37  ;;  %v217_v29 = vpop.permute.xlu1 %216 }
 0x188   :  { %v1988_v24 = vpop.eup %1987 }
 0x189   :  { %v80_v25 = vmul.f32 %v1988_v24, %v78_v23  ;;  %vm85_vm5 = vweird.f32 %v1988_v24  ;;  %v1246_v23 = vld.sshfl [vmem:[#allocation1 + $0x28] sm:$0xff pattern:$0x75316420] }
 0x18a   :  { %vm86_vm7 = vmor %vm84_vm6, %vm85_vm5  ;;  %1416 = vst [vmem:[#allocation1 + $0x20] ss:$2 sm:$0xff] %v2141_v36  ;;  %vm1618_vm5 = vcmask 736256  }
 0x18b   :  { %v81_v26 = vsub.f32 1.0, %v80_v25  ;;  %v1242_v25 = vld.sshfl [vmem:[#allocation1 + $0x8] sm:$0xff pattern:$0x75316420] }
 0x18d   :  { %v82_v28 = vmul.f32 %v1988_v24, %v81_v26 }
 0x18f   :  { %v83_v30 = vadd.f32 %v1988_v24, %v82_v28  ;;  %v1425_v28 = vld.sshfl [vmem:[#allocation1 + $0x30] sm:$0xff pattern:$0x75316420] }
 0x190   :  { %1596 = vst [vmem:[#allocation1 + $0x30] ss:$2 sm:$0xff] %v2185_v58 }
 0x191   :  { %v87_v32 = vsel %vm86_vm7, %v1988_v24, %v83_v30  ;;  %v1241_v24 = vld.sshfl [vmem:[#allocation1] sm:$0xff pattern:$0x75316420] }
 0x192   :  { %v92_v33 = vsel %vm89_vm8, %v91_v31, %v87_v32  ;;  %1412 = vst [vmem:[#allocation1] ss:$2 sm:$0xff] %v2136_v35  ;;  %v1423_v30 = vld.sshfl [vmem:[#allocation1 + $0x20] sm:$0xff pattern:$0x75316420] }
 0x193   :  { %v93_v34 = vmul.f32 %v92_v33, %v48_v2  ;;  %v710_v2 = vld.sshfl [vmem:[#allocation1 + $0x18] sm:$0xff pattern:$0x75316420]  ;;  %v1424_v31 = vld.sshfl [vmem:[#allocation1 + $0x28] sm:$0xff pattern:$0x75316420] }
 0x194   :  { %880 = vst [vmem:[#allocation1 + $0x10] ss:$2 sm:$0xff] %v2162_v45  ;;  %720 = vrot.lane.b32.xlu2 %v710_v2, %s2073_s4 }
 0x195   :  { %1842 = vmatmul.msk.f32.vlgmr.msra.gmra.mxu1 %vm94_vm4, %v93_v34  ;;  %1792 = vst.msk [vmem:[#allocation6] sm:$0x1] %vm52_vm1, %v93_v34  ;;  %vm1440_vm4 = vcmask 744448  }
 0x196   :  { %1594 = vst [vmem:[#allocation1 + $0x20] ss:$2 sm:$0xff] %v2141_v36 }
 0x199   :  { %v1420_v32 = vld.sshfl [vmem:[#allocation1 + $0x8] sm:$0xff pattern:$0x75316420]  ;;  %v1419_v33 = vld.sshfl [vmem:[#allocation1] sm:$0xff pattern:$0x75316420] }
 0x19a   :  { %1590 = vst [vmem:[#allocation1] ss:$2 sm:$0xff] %v2136_v35 }
 0x19b   :  { %v887_v5 = vld.sshfl [vmem:[#allocation1 + $0x10] sm:$0xff pattern:$0x75316420]  ;;  %v888_v6 = vld.sshfl [vmem:[#allocation1 + $0x18] sm:$0xff pattern:$0x75316420] }
 0x19c   :  { %1058 = vst [vmem:[#allocation1 + $0x10] ss:$2 sm:$0xff] %v2162_v45  ;;  %898 = vrot.lane.b32.xlu1 %v888_v6, %s2074_s16  ;;  %724 = vrot.lane.b32.xlu2 %v712_v0, %s2073_s4  ;;  %v1843_v0 = vld [vmem:[%s2471_s1 + $0x8] sm:$0xff]  ;;  %v1603_v6 = vld.sshfl [vmem:[#allocation1 + $0x30] sm:$0xff pattern:$0x75316420] }
 0x19d   :  { %v1601_v61 = vld.sshfl [vmem:[#allocation1 + $0x20] sm:$0xff pattern:$0x75316420]  ;;  %v1602_v1 = vld.sshfl [vmem:[#allocation1 + $0x28] sm:$0xff pattern:$0x75316420] }
 0x1a3   :  { %v1065_v11 = vld.sshfl [vmem:[#allocation1 + $0x10] sm:$0xff pattern:$0x75316420]  ;;  %v1066_v12 = vld.sshfl [vmem:[#allocation1 + $0x18] sm:$0xff pattern:$0x75316420] }
 0x1a4   :  { %904 = vrot.lane.b32.xlu1 %v891_v10, %s2074_s16  ;;  %1236 = vst [vmem:[#allocation1 + $0x10] ss:$2 sm:$0xff] %v2162_v45  ;;  %894 = vrot.lane.b32.xlu2 %v886_v13, %s2074_s16 }
 0x1ab   :  { %v1243_v17 = vld.sshfl [vmem:[#allocation1 + $0x10] sm:$0xff pattern:$0x75316420]  ;;  %v1244_v20 = vld.sshfl [vmem:[#allocation1 + $0x18] sm:$0xff pattern:$0x75316420] }
 0x1ac   :  { %1076 = vrot.lane.b32.xlu1 %v1066_v12, %s2075_s17  ;;  %900 = vrot.lane.b32.xlu2 %v889_v4, %s2074_s16  ;;  %1414 = vst [vmem:[#allocation1 + $0x10] ss:$2 sm:$0xff] %v2162_v45 }
 0x1b3   :  { %v1421_v26 = vld.sshfl [vmem:[#allocation1 + $0x10] sm:$0xff pattern:$0x75316420]  ;;  %v1422_v27 = vld.sshfl [vmem:[#allocation1 + $0x18] sm:$0xff pattern:$0x75316420] }
 0x1b4   :  { %1080 = vrot.lane.b32.xlu1 %v1068_v16, %s2075_s17  ;;  %1072 = vrot.lane.b32.xlu2 %v1064_v19, %s2075_s17  ;;  %1592 = vst [vmem:[#allocation1 + $0x10] ss:$2 sm:$0xff] %v2162_v45  ;;  %v219_v45 = vpop.permute.xlu1 %218 }
 0x1b5   :  { %v231_v62 = vsel %vm230_vm10, %v217_v29, %v219_v45 }
 0x1b6   :  { %1844 = vmatpush.msk.msra.mxu2 %vm241_vm11, %v231_v62 }
 0x1b7   :  { %1845 = vmatmul.msk.f32.vlgmr.msra.gmra.mxu2 %vm237_vm12, %v1843_v0 }
 0x1bb   :  { %v1599_v53 = vld.sshfl [vmem:[#allocation1 + $0x10] sm:$0xff pattern:$0x75316420] }
 0x1bc   :  { %1250 = vrot.lane.b32.xlu1 %v1242_v25, %s2076_s18  ;;  %1070 = vrot.lane.b32.xlu2 %v1063_v18, %s2075_s17 }
 0x1c4   :  { %1256 = vrot.lane.b32.xlu1 %v1245_v22, %s2076_s18  ;;  %1082 = vrot.lane.b32.xlu2 %v1069_v14, %s2075_s17  ;;  %v1600_v14 = vld.sshfl [vmem:[#allocation1 + $0x18] sm:$0xff pattern:$0x75316420] }
 0x1cc   :  { %1428 = vrot.lane.b32.xlu1 %v1420_v32, %s2077_s19  ;;  %1252 = vrot.lane.b32.xlu2 %v1243_v17, %s2076_s18 }
 0x1d4   :  { %1426 = vrot.lane.b32.xlu1 %v1419_v33, %s2077_s19  ;;  %1258 = vrot.lane.b32.xlu2 %v1246_v23, %s2076_s18 }
 0x1dc   :  { %1438 = vrot.lane.b32.xlu1 %v1425_v28, %s2077_s19  ;;  %1430 = vrot.lane.b32.xlu2 %v1421_v26, %s2077_s19 }
 0x1e4   :  { %1608 = vrot.lane.b32.xlu1 %v1599_v53, %s2078_s20  ;;  %1434 = vrot.lane.b32.xlu2 %v1423_v30, %s2077_s19 }
 0x1ec   :  { %1614 = vrot.lane.b32.xlu1 %v1602_v1, %s2078_s20 }
 0x212   :  { %v2167_v49 = vpop.f32.mrf.mxu1 }
 0x213   :  { %v121_v52 = vmul.f32 %v2167_v49, %v2167_v49 }
 0x215   :  { %v123_v54 = vsel %vm122_vm9, %v121_v52, 0.0  ;;  %v1598_v52 = vld.sshfl [vmem:[#allocation1 + $0x8] sm:$0xff pattern:$0x75316420] }
 0x216   :  { %124 = vadd.xlane.f32.xlu0 %v123_v54 }
 0x22a   :  { %224 = vrot.lane.b32.xlu0 %v213_v40, %s2071_s10  ;;  %v221_v40 = vpop.permute.xlu2 %220 }
 0x232   :  { %544 = vrot.lane.b32.xlu0 %v533_v48, %s2072_s13  ;;  %v223_v35 = vpop.permute.xlu2 %222  ;;  %v227_v48 = vpop.permute.xlu1 %226 }
 0x233   :  { %v233_v58 = vsel %vm230_vm10, %v221_v40, %v223_v35 }
 0x234   :  { %1848 = vmatpush.msk.msrb.mxu0 %vm241_vm11, %v233_v58 }
 0x235   :  { %1849 = vmatmul.msk.f32.vlgmr.msrb.gmra.mxu0 %vm237_vm12, %v1843_v0 }
 0x236   :  { %1856 = vmatpush.msk.msra.mxu0 %vm241_vm11, %v2148_v41 }
 0x238   :  { %1864 = vmatpush.msk.msrb.mxu0 %vm241_vm11, %v2154_v43  ;;  %v195_v43 = vld [vmem:[%s2471_s1] sm:$0xff] }
 0x23a   :  { %716 = vrot.lane.b32.xlu0 %v708_v57, %s2073_s4  ;;  %v229_v50 = vpop.permute.xlu2 %228  ;;  %v537_v51 = vpop.permute.xlu1 %536  ;;  %v232_v57 = vsel %vm230_vm10, %v219_v45, %v221_v40  ;;  %v1881_v45 = vld [vmem:[%s2471_s1 + $0x18] sm:$0xff] }
 0x23b   :  { %1846 = vmatpush.msk.msra.mxu3 %vm241_vm11, %v232_v57  ;;  %v236_v2 = vsel %vm230_vm10, %v227_v48, %v229_v50 }
 0x23c   :  { %1847 = vmatmul.msk.f32.vlgmr.msra.gmra.mxu3 %vm237_vm12, %v1843_v0  ;;  %1854 = vmatpush.msk.msrb.mxu1 %vm241_vm11, %v236_v2 }
 0x23d   :  { %1855 = vmatmul.msk.f32.vlgmr.msrb.gmra.mxu1 %vm237_vm12, %v1843_v0  ;;  %1857 = vmatmul.msk.f32.vlgmr.msra.gmra.mxu0 %vm237_vm12, %v195_v43 }
 0x23e   :  { %1862 = vmatpush.msk.msra.mxu1 %vm241_vm11, %v2178_v56 }
 0x242   :  { %714 = vrot.lane.b32.xlu0 %v707_v59, %s2073_s4  ;;  %v539_v59 = vpop.permute.xlu2 %538  ;;  %v541_v60 = vpop.permute.xlu1 %540 }
 0x243   :  { %v552_v3 = vsel %vm550_vm13, %v539_v59, %v541_v60 }
 0x244   :  { %1871 = vmatpush.msk.msrb.mxu1 %vm241_vm11, %v552_v3  ;;  %v1894_v3 = vld [vmem:[%s2471_s1 + $0x20] sm:$0xff] }
 0x245   :  { %1863 = vmatmul.msk.f32.vlgmr.msra.gmra.mxu1 %vm237_vm12, %v195_v43  ;;  %1865 = vmatmul.msk.f32.vlgmr.msrb.gmra.mxu0 %vm237_vm12, %v195_v43 }
 0x24a   :  { %726 = vrot.lane.b32.xlu0 %v713_v7, %s2073_s4  ;;  %v543_v4 = vpop.permute.xlu2 %542 }
 0x24b   :  { %v553_v9 = vsel %vm550_vm13, %v541_v60, %v543_v4 }
 0x24c   :  { %1873 = vmatpush.msk.msra.mxu0 %vm241_vm11, %v553_v9 }
 0x252   :  { %896 = vrot.lane.b32.xlu0 %v887_v5, %s2074_s16  ;;  %v547_v5 = vpop.permute.xlu1 %546  ;;  %v549_v56 = vpop.permute.xlu2 %548 }
 0x253   :  { %v556_v12 = vsel %vm550_vm13, %v547_v5, %v549_v56 }
 0x254   :  { %1879 = vmatpush.msk.msra.mxu1 %vm241_vm11, %v556_v12 }
 0x25a   :  { %902 = vrot.lane.b32.xlu0 %v890_v8, %s2074_s16  ;;  %v719_v8 = vpop.permute.xlu1 %718 }
 0x262   :  { %1074 = vrot.lane.b32.xlu0 %v1065_v11, %s2075_s17  ;;  %v551_v11 = vsel %vm550_vm13, %v537_v51, %v539_v59 }
 0x26a   :  { %1078 = vrot.lane.b32.xlu0 %v1067_v15, %s2075_s17  ;;  %v723_v15 = vpop.permute.xlu1 %722  ;;  %s2080_s17 = smov [#allocation4]  }
 0x272   :  { %1248 = vrot.lane.b32.xlu0 %v1241_v24, %s2076_s18  ;;  %v893_v24 = vpop.permute.xlu1 %892 }
 0x27a   :  { %1254 = vrot.lane.b32.xlu0 %v1244_v20, %s2076_s18 }
 0x282   :  { %1260 = vrot.lane.b32.xlu0 %v1247_v21, %s2076_s18  ;;  %v1868_v21 = vld [vmem:[%s2471_s1 + $0x10] sm:$0xff]  ;;  %s1809_s18 = sshll.u32 %s2080_s17, 4  ;;  %s1810_s18 = int_to_ptr.vmem [resolvable:$true] %s1809_s18 }
 0x283   :  { %1872 = vmatmul.msk.f32.vlgmr.msrb.gmra.mxu1 %vm237_vm12, %v1868_v21  ;;  %1874 = vmatmul.msk.f32.vlgmr.msra.gmra.mxu0 %vm237_vm12, %v1868_v21 }
 0x289   :  { %v125_v34 = vpop.xlane.xlu0 %124 }
 0x28a   :  { %v126_v37 = vrot.slane %v125_v34, 4  ;;  %1432 = vrot.lane.b32.xlu0 %v1422_v27, %s2077_s19 }
 0x28b   :  { %1880 = vmatmul.msk.f32.vlgmr.msra.gmra.mxu1 %vm237_vm12, %v1868_v21 }
 0x28c   :  { %v127_v38 = vadd.f32 %v126_v37, %v125_v34  ;;  %v899_v34 = vpop.permute.xlu1 %898 }
 0x28e   :  { %v128_v39 = vrot.slane %v127_v38, 2 }
 0x290   :  { %v129_v46 = vadd.f32 %v128_v39, %v127_v38 }
 0x292   :  { %v130_v36 = vrot.slane %v129_v46, 1  ;;  %1436 = vrot.lane.b32.xlu0 %v1424_v31, %s2077_s19 }
 0x294   :  { %v131_v47 = vadd.f32 %v130_v36, %v129_v46 }
 0x296   :  { %1963 = vpush %v131_v47 }
 0x29a   :  { %1606 = vrot.lane.b32.xlu0 %v1598_v52, %s2078_s20  ;;  %v905_v52 = vpop.permute.xlu1 %904 }
 0x29c   :  { %v225_v54 = vpop.permute.xlu0 %224 }
 0x29d   :  { %v234_v63 = vsel %vm230_vm10, %v223_v35, %v225_v54  ;;  %v235_v10 = vsel %vm230_vm10, %v225_v54, %v227_v48 }
 0x29e   :  { %1850 = vmatpush.msk.msrb.mxu2 %vm241_vm11, %v234_v63  ;;  %1852 = vmatpush.msk.msrb.mxu3 %vm241_vm11, %v235_v10  ;;  %v1907_v10 = vld [vmem:[%s2471_s1 + $0x28] sm:$0xff] }
 0x29f   :  { %1851 = vmatmul.msk.f32.vlgmr.msrb.gmra.mxu2 %vm237_vm12, %v1843_v0  ;;  %1853 = vmatmul.msk.f32.vlgmr.msrb.gmra.mxu3 %vm237_vm12, %v1843_v0 }
 0x2a0   :  { %1858 = vmatpush.msk.msra.mxu2 %vm241_vm11, %v2150_v42  ;;  %v1597_v42 = vld.sshfl [vmem:[#allocation1] sm:$0xff pattern:$0x75316420]  ;;  %1860 = vmatpush.msk.msra.mxu3 %vm241_vm11, %v2176_v55  ;;  %v721_v55 = vpop.permute.xlu2 %720 }
 0x2a1   :  { %1604 = vrot.lane.b32.xlu2 %v1597_v42, %s2078_s20  ;;  %v732_v19 = vsel %vm728_vm14, %v721_v55, %v723_v15  ;;  %v731_v27 = vsel %vm728_vm14, %v719_v8, %v721_v55 }
 0x2a2   :  { %1612 = vrot.lane.b32.xlu0 %v1601_v61, %s2078_s20  ;;  %1866 = vmatpush.msk.msrb.mxu2 %vm241_vm11, %v2156_v44  ;;  %v1077_v59 = vpop.permute.xlu1 %1076 }
 0x2a3   :  { %1869 = vmatpush.msk.msrb.mxu3 %vm241_vm11, %v551_v11  ;;  %1888 = vmatpush.msk.msrb.mxu1 %vm241_vm11, %v732_v19 }
 0x2a4   :  { %v545_v41 = vpop.permute.xlu0 %544  ;;  %1889 = vmatmul.msk.f32.vlgmr.msrb.gmra.mxu1 %vm237_vm12, %v1881_v45 }
 0x2a5   :  { %v554_v44 = vsel %vm550_vm13, %v543_v4, %v545_v41  ;;  %v555_v17 = vsel %vm550_vm13, %v545_v41, %v547_v5 }
 0x2a7   :  { %1859 = vmatmul.msk.f32.vlgmr.msra.gmra.mxu2 %vm237_vm12, %v195_v43  ;;  %1861 = vmatmul.msk.f32.vlgmr.msra.gmra.mxu3 %vm237_vm12, %v195_v43 }
 0x2a8   :  { %1875 = vmatpush.msk.msra.mxu2 %vm241_vm11, %v554_v44  ;;  %1877 = vmatpush.msk.msra.mxu3 %vm241_vm11, %v555_v17  ;;  %v725_v23 = vpop.permute.xlu2 %724 }
 0x2a9   :  { %1610 = vrot.lane.b32.xlu2 %v1600_v14, %s2078_s20  ;;  %v733_v25 = vsel %vm728_vm14, %v723_v15, %v725_v23  ;;  %v1920_v15 = vld [vmem:[%s2471_s1 + $0x30] sm:$0xff] }
 0x2aa   :  { %1616 = vrot.lane.b32.xlu0 %v1603_v6, %s2078_s20  ;;  %v1081_v63 = vpop.permute.xlu1 %1080 }
 0x2ac   :  { %v717_v7 = vpop.permute.xlu0 %716 }
 0x2ad   :  { %v730_v20 = vsel %vm728_vm14, %v717_v7, %v719_v8 }
 0x2af   :  { %1867 = vmatmul.msk.f32.vlgmr.msrb.gmra.mxu2 %vm237_vm12, %v195_v43  ;;  %1870 = vmatmul.msk.f32.vlgmr.msrb.gmra.mxu3 %vm237_vm12, %v1868_v21 }
 0x2b0   :  { %1884 = vmatpush.msk.msrb.mxu2 %vm241_vm11, %v730_v20  ;;  %1886 = vmatpush.msk.msrb.mxu3 %vm241_vm11, %v731_v27  ;;  %v895_v33 = vpop.permute.xlu2 %894 }
 0x2b1   :  { %v907_v40 = vsel %vm906_vm15, %v893_v24, %v895_v33 }
 0x2b4   :  { %v715_v13 = vpop.permute.xlu0 %714 }
 0x2b5   :  { %v729_v16 = vsel %vm728_vm14, %v715_v13, %v717_v7  ;;  %v1251_v7 = vpop.permute.xlu1 %1250 }
 0x2b6   :  { %1882 = vmatpush.msk.msrb.mxu0 %vm241_vm11, %v729_v16 }
 0x2b7   :  { %1876 = vmatmul.msk.f32.vlgmr.msra.gmra.mxu2 %vm237_vm12, %v1868_v21  ;;  %1883 = vmatmul.msk.f32.vlgmr.msrb.gmra.mxu0 %vm237_vm12, %v1881_v45 }
 0x2b8   :  { %1890 = vmatpush.msk.msra.mxu0 %vm241_vm11, %v733_v25  ;;  %1878 = vmatmul.msk.f32.vlgmr.msra.gmra.mxu3 %vm237_vm12, %v1868_v21  ;;  %v901_v51 = vpop.permute.xlu2 %900 }
 0x2b9   :  { %1895 = vmatpush.msk.msra.mxu3 %vm241_vm11, %v907_v40  ;;  %v910_v53 = vsel %vm906_vm15, %v899_v34, %v901_v51 }
 0x2bc   :  { %v727_v22 = vpop.permute.xlu0 %726 }
 0x2bd   :  { %v734_v29 = vsel %vm728_vm14, %v725_v23, %v727_v22  ;;  %v1257_v9 = vpop.permute.xlu1 %1256 }
 0x2be   :  { %1892 = vmatpush.msk.msra.mxu2 %vm241_vm11, %v734_v29 }
 0x2bf   :  { %1885 = vmatmul.msk.f32.vlgmr.msrb.gmra.mxu2 %vm237_vm12, %v1881_v45  ;;  %1891 = vmatmul.msk.f32.vlgmr.msra.gmra.mxu0 %vm237_vm12, %v1881_v45 }
 0x2c0   :  { %1901 = vmatpush.msk.msrb.mxu2 %vm241_vm11, %v910_v53  ;;  %1887 = vmatmul.msk.f32.vlgmr.msrb.gmra.mxu3 %vm237_vm12, %v1881_v45  ;;  %v1073_v60 = vpop.permute.xlu2 %1072 }
 0x2c4   :  { %v897_v31 = vpop.permute.xlu0 %896 }
 0x2c5   :  { %v908_v38 = vsel %vm906_vm15, %v895_v33, %v897_v31  ;;  %v909_v39 = vsel %vm906_vm15, %v897_v31, %v899_v34  ;;  %v1429_v55 = vpop.permute.xlu1 %1428 }
 0x2c6   :  { %1897 = vmatpush.msk.msra.mxu1 %vm241_vm11, %v908_v38  ;;  %1899 = vmatpush.msk.msrb.mxu0 %vm241_vm11, %v909_v39 }
 0x2c7   :  { %s1964_s25 = spop %1963  ;;  %1893 = vmatmul.msk.f32.vlgmr.msra.gmra.mxu2 %vm237_vm12, %v1881_v45  ;;  %1898 = vmatmul.msk.f32.vlgmr.msra.gmra.mxu1 %vm237_vm12, %v1894_v3 }
 0x2c8   :  { %v133_v18 = vstv %s1964_s25  ;;  %v1071_v0 = vpop.permute.xlu2 %1070  ;;  %1896 = vmatmul.msk.f32.vlgmr.msra.gmra.mxu3 %vm237_vm12, %v1894_v3  ;;  %1900 = vmatmul.msk.f32.vlgmr.msrb.gmra.mxu0 %vm237_vm12, %v1894_v3  ;;  %s1822_s25 = sshll.u32 %s2477_s7, 4  ;;  %s1823_s25 = int_to_ptr.hbm [resolvable:$true] %s1822_s25 }
 0x2c9   :  { %1989 = vrsqrt.f32 %v133_v18  ;;  %vm141_vm0 = vcmp.eq.f32.partialorder %v133_v18, inf  ;;  %v144_v47 = vand.u32 2147483648, %v133_v18  ;;  %vm143_vm1 = vcmp.eq.f32.partialorder %v133_v18, 0.0 }
 0x2ca   :  { %v1085_v1 = vsel %vm1084_vm2, %v1071_v0, %v1073_v60 }
 0x2cb   :  { %1908 = vmatpush.msk.msra.mxu0 %vm241_vm11, %v1085_v1  ;;  %v311_v1 = vpop.f32.mrf.mxu0 }
 0x2cc   :  { %v903_v35 = vpop.permute.xlu0 %902 }
 0x2cd   :  { %v912_v54 = vsel %vm906_vm15, %v903_v35, %v905_v52  ;;  %v911_v57 = vsel %vm906_vm15, %v901_v51, %v903_v35  ;;  %v1427_v20 = vpop.permute.xlu1 %1426 }
 0x2ce   :  { %1905 = vmatpush.msk.msrb.mxu1 %vm241_vm11, %v912_v54  ;;  %1903 = vmatpush.msk.msrb.mxu3 %vm241_vm11, %v911_v57  ;;  %v1441_v23 = vsel %vm1440_vm4, %v1427_v20, %v1429_v55 }
 0x2cf   :  { %v1990_v26 = vpop.eup %1989  ;;  %1902 = vmatmul.msk.f32.vlgmr.msrb.gmra.mxu2 %vm237_vm12, %v1894_v3  ;;  %1906 = vmatmul.msk.f32.vlgmr.msrb.gmra.mxu1 %vm237_vm12, %v1894_v3 }
 0x2d0   :  { %v135_v28 = vmul.f32 %v1990_v26, %v133_v18  ;;  %v1083_v6 = vpop.permute.xlu2 %1082  ;;  %1904 = vmatmul.msk.f32.vlgmr.msrb.gmra.mxu3 %vm237_vm12, %v1894_v3  ;;  %1909 = vmatmul.msk.f32.vlgmr.msra.gmra.mxu0 %vm237_vm12, %v1907_v10  ;;  %v291_v3 = vpop.f32.mrf.mxu3 }
 0x2d1   :  { %v1090_v42 = vsel %vm1084_vm2, %v1081_v63, %v1083_v6 }
 0x2d2   :  { %v136_v30 = vmul.f32 %v1990_v26, %v135_v28  ;;  %v1933_v28 = vld [vmem:[%s2471_s1 + $0x38] sm:$0xff] }
 0x2d4   :  { %v137_v32 = vmul.f32 0.5, %v136_v30  ;;  %v1075_v58 = vpop.permute.xlu0 %1074 }
 0x2d5   :  { %v1086_v61 = vsel %vm1084_vm2, %v1073_v60, %v1075_v58  ;;  %v1087_v2 = vsel %vm1084_vm2, %v1075_v58, %v1077_v59  ;;  %v1439_v27 = vpop.permute.xlu1 %1438 }
 0x2d6   :  { %v138_v37 = vsub.f32 1.5, %v137_v32  ;;  %1910 = vmatpush.msk.msra.mxu2 %vm241_vm11, %v1086_v61  ;;  %1912 = vmatpush.msk.msra.mxu3 %vm241_vm11, %v1087_v2  ;;  %v371_v2 = vpop.f32.mrf.mxu1 }
 0x2d7   :  { %1911 = vmatmul.msk.f32.vlgmr.msra.gmra.mxu2 %vm237_vm12, %v1907_v10 }
 0x2d8   :  { %v139_v46 = vmul.f32 %v1990_v26, %v138_v37  ;;  %v1253_v8 = vpop.permute.xlu2 %1252  ;;  %1913 = vmatmul.msk.f32.vlgmr.msra.gmra.mxu3 %vm237_vm12, %v1907_v10  ;;  %1918 = vmatpush.msk.msrb.mxu2 %vm241_vm11, %v1090_v42 }
 0x2d9   :  { %v1264_v43 = vsel %vm1262_vm3, %v1251_v7, %v1253_v8 }
 0x2da   :  { %v140_v36 = vmul.f32 %v139_v46, %v133_v18  ;;  %v1946_v46 = vld [vmem:[%s2471_s1 + $0x40] sm:$0xff] }
 0x2dc   :  { %v142_v48 = vsel %vm141_vm0, %v133_v18, %v140_v36  ;;  %v1079_v62 = vpop.permute.xlu0 %1078 }
 0x2dd   :  { %v145_v50 = vsel %vm143_vm1, %v144_v47, %v142_v48  ;;  %v1088_v41 = vsel %vm1084_vm2, %v1077_v59, %v1079_v62  ;;  %v1089_v4 = vsel %vm1084_vm2, %v1079_v62, %v1081_v63  ;;  %v1609_v40 = vpop.permute.xlu1 %1608 }
 0x2de   :  { %1965 = vpush %v145_v50  ;;  %1914 = vmatpush.msk.msra.mxu1 %vm241_vm11, %v1088_v41  ;;  %1916 = vmatpush.msk.msrb.mxu0 %vm241_vm11, %v1089_v4  ;;  %v271_v41 = vpop.f32.mrf.mxu2  ;;  %v417_v4 = vpop.f32.mrf.mxu0 }
 0x2df   :  { %1915 = vmatmul.msk.f32.vlgmr.msra.gmra.mxu1 %vm237_vm12, %v1907_v10  ;;  %1919 = vmatmul.msk.f32.vlgmr.msrb.gmra.mxu2 %vm237_vm12, %v1907_v10  ;;  %v418_v6 = vadd.f32 %v417_v4, %v271_v41 }
 0x2e0   :  { %1923 = vmatpush.msk.msrb.mxu1 %vm241_vm11, %v1264_v43  ;;  %v1259_v14 = vpop.permute.xlu2 %1258  ;;  %1917 = vmatmul.msk.f32.vlgmr.msrb.gmra.mxu0 %vm237_vm12, %v1907_v10 }
 0x2e1   :  { %v1267_v16 = vsel %vm1262_vm3, %v1257_v9, %v1259_v14 }
 0x2e4   :  { %v1249_v5 = vpop.permute.xlu0 %1248 }
 0x2e5   :  { %v1263_v11 = vsel %vm1262_vm3, %v1249_v5, %v1251_v7  ;;  %v1615_v57 = vpop.permute.xlu1 %1614  ;;  %v477_v7 = vpop.f32.mrf.mxu1 }
 0x2e6   :  { %1921 = vmatpush.msk.msrb.mxu3 %vm241_vm11, %v1263_v11 }
 0x2e7   :  { %1922 = vmatmul.msk.f32.vlgmr.msrb.gmra.mxu3 %vm237_vm12, %v1920_v15  ;;  %1924 = vmatmul.msk.f32.vlgmr.msrb.gmra.mxu1 %vm237_vm12, %v1920_v15 }
 0x2e8   :  { %1929 = vmatpush.msk.msra.mxu3 %vm241_vm11, %v1267_v16  ;;  %v1431_v19 = vpop.permute.xlu2 %1430 }
 0x2e9   :  { %v1442_v21 = vsel %vm1440_vm4, %v1429_v55, %v1431_v19 }
 0x2ec   :  { %v1255_v56 = vpop.permute.xlu0 %1254 }
 0x2ed   :  { %v1265_v12 = vsel %vm1262_vm3, %v1253_v8, %v1255_v56  ;;  %v1266_v44 = vsel %vm1262_vm3, %v1255_v56, %v1257_v9  ;;  %v497_v9 = vpop.f32.mrf.mxu0 }
 0x2ee   :  { %1927 = vmatpush.msk.msra.mxu2 %vm241_vm11, %v1266_v44  ;;  %1925 = vmatpush.msk.msra.mxu0 %vm241_vm11, %v1265_v12 }
 0x2ef   :  { %1928 = vmatmul.msk.f32.vlgmr.msra.gmra.mxu2 %vm237_vm12, %v1920_v15  ;;  %1930 = vmatmul.msk.f32.vlgmr.msra.gmra.mxu3 %vm237_vm12, %v1920_v15 }
 0x2f0   :  { %1936 = vmatpush.msk.msrb.mxu2 %vm241_vm11, %v1442_v21  ;;  %1926 = vmatmul.msk.f32.vlgmr.msra.gmra.mxu0 %vm237_vm12, %v1920_v15  ;;  %v1435_v26 = vpop.permute.xlu2 %1434 }
 0x2f1   :  { %1934 = vmatpush.msk.msrb.mxu0 %vm241_vm11, %v1441_v23 }
 0x2f4   :  { %v1261_v13 = vpop.permute.xlu0 %1260 }
 0x2f5   :  { %v1268_v17 = vsel %vm1262_vm3, %v1259_v14, %v1261_v13 }
 0x2f6   :  { %1931 = vmatpush.msk.msra.mxu1 %vm241_vm11, %v1268_v17  ;;  %v1773_v17 = vld [vmem:[%s2473_s3] sm:$0xff]  ;;  %s2081_s3 = smov [#allocation6]  }
 0x2f7   :  { %1932 = vmatmul.msk.f32.vlgmr.msra.gmra.mxu1 %vm237_vm12, %v1920_v15  ;;  %1937 = vmatmul.msk.f32.vlgmr.msrb.gmra.mxu2 %vm237_vm12, %v1933_v28  ;;  %s1820_s22 = sshll.u32 %s2081_s3, 4  ;;  %s1821_s22 = int_to_ptr.vmem [resolvable:$true] %s1820_s22 }
 0x2f8   :  { %1935 = vmatmul.msk.f32.vlgmr.msrb.gmra.mxu0 %vm237_vm12, %v1933_v28 }
 0x2fb   :  { %v1605_v45 = vpop.permute.xlu2 %1604 }
 0x2fc   :  { %v1433_v18 = vpop.permute.xlu0 %1432 }
 0x2fd   :  { %v1443_v22 = vsel %vm1440_vm4, %v1431_v19, %v1433_v18  ;;  %v1444_v29 = vsel %vm1440_vm4, %v1433_v18, %v1435_v26  ;;  %v2079_v18 = vmov 0  }
 0x2fe   :  { %1938 = vmatpush.msk.msrb.mxu3 %vm241_vm11, %v1443_v22  ;;  %1940 = vmatpush.msk.msrb.mxu1 %vm241_vm11, %v1444_v29 }
 0x2ff   :  { %1939 = vmatmul.msk.f32.vlgmr.msrb.gmra.mxu3 %vm237_vm12, %v1933_v28  ;;  %1941 = vmatmul.msk.f32.vlgmr.msrb.gmra.mxu1 %vm237_vm12, %v1933_v28 }
 0x300   :  { %v609_v43 = vpop.f32.mrf.mxu1  ;;  %1983 = vset.pattern.permute.xlu1 %v2079_v18  ;;  %1984 = vset.pattern.permute.xlu0 %v2079_v18 }
 0x301   :  { %1776 = vperm.xlu1 %1983, %v1773_v17  }
 0x303   :  { %v1611_v58 = vpop.permute.xlu2 %1610 }
 0x304   :  { %v1437_v25 = vpop.permute.xlu0 %1436  ;;  %v1621_v61 = vsel %vm1618_vm5, %v1609_v40, %v1611_v58 }
 0x305   :  { %v1446_v30 = vsel %vm1440_vm4, %v1437_v25, %v1439_v27  ;;  %v1445_v31 = vsel %vm1440_vm4, %v1435_v26, %v1437_v25  ;;  %v629_v26 = vpop.f32.mrf.mxu0 }
 0x306   :  { %1944 = vmatpush.msk.msra.mxu2 %vm241_vm11, %v1446_v30  ;;  %1942 = vmatpush.msk.msra.mxu0 %vm241_vm11, %v1445_v31 }
 0x307   :  { %1945 = vmatmul.msk.f32.vlgmr.msra.gmra.mxu2 %vm237_vm12, %v1933_v28  ;;  %1943 = vmatmul.msk.f32.vlgmr.msra.gmra.mxu0 %vm237_vm12, %v1933_v28 }
 0x308   :  { %1951 = vmatpush.msk.msrb.mxu0 %vm241_vm11, %v1621_v61  ;;  %v689_v29 = vpop.f32.mrf.mxu1 }
 0x30c   :  { %v1607_v34 = vpop.permute.xlu0 %1606 }
 0x30d   :  { %v1620_v47 = vsel %vm1618_vm5, %v1607_v34, %v1609_v40  ;;  %v1619_v35 = vsel %vm1618_vm5, %v1605_v45, %v1607_v34 }
 0x30e   :  { %1947 = vmatpush.msk.msra.mxu3 %vm241_vm11, %v1619_v35  ;;  %1949 = vmatpush.msk.msra.mxu1 %vm241_vm11, %v1620_v47 }
 0x30f   :  { %s1966_s11 = spop %1965  ;;  %1948 = vmatmul.msk.f32.vlgmr.msra.gmra.mxu3 %vm237_vm12, %v1946_v46  ;;  %1950 = vmatmul.msk.f32.vlgmr.msra.gmra.mxu1 %vm237_vm12, %v1946_v46 }
 0x310   :  { %s147_s12 = sadd.f32 1e-12, %s1966_s11  ;;  %1952 = vmatmul.msk.f32.vlgmr.msrb.gmra.mxu0 %vm237_vm12, %v1946_v46 }
 0x312   :  { %v148_v24 = vstv %s147_s12 }
 0x313   :  { %1991 = vrcp.f32 %v148_v24  ;;  %v158_v38 = vand.u32 2147483647, %v148_v24  ;;  %v160_v39 = vand.u32 2147483648, %v148_v24  ;;  %vm154_vm7 = vweird.f32 %v148_v24 }
 0x314   :  { %v1613_v53 = vpop.permute.xlu0 %1612 }
 0x315   :  { %v161_v50 = vor.u32 1.1754944e-38, %v160_v39  ;;  %vm159_vm10 = vcmp.eq.f32.partialorder %v158_v38, 8.507059e+37  ;;  %v1623_v60 = vsel %vm1618_vm5, %v1613_v53, %v1615_v57  ;;  %v1622_v62 = vsel %vm1618_vm5, %v1611_v58, %v1613_v53 }
 0x316   :  { %1953 = vmatpush.msk.msrb.mxu2 %vm241_vm11, %v1622_v62  ;;  %1955 = vmatpush.msk.msrb.mxu3 %vm241_vm11, %v1623_v60 }
 0x317   :  { %1954 = vmatmul.msk.f32.vlgmr.msrb.gmra.mxu2 %vm237_vm12, %v1946_v46  ;;  %1956 = vmatmul.msk.f32.vlgmr.msrb.gmra.mxu3 %vm237_vm12, %v1946_v46 }
 0x319   :  { %v1992_v32 = vpop.eup %1991 }
 0x31a   :  { %v150_v33 = vmul.f32 %v1992_v32, %v148_v24  ;;  %vm155_vm6 = vweird.f32 %v1992_v32 }
 0x31b   :  { %vm156_vm8 = vmor %vm154_vm7, %vm155_vm6 }
 0x31c   :  { %v151_v37 = vsub.f32 1.0, %v150_v33 }
 0x31e   :  { %v152_v36 = vmul.f32 %v1992_v32, %v151_v37 }
 0x320   :  { %v153_v48 = vadd.f32 %v1992_v32, %v152_v36 }
 0x321   :  { %v827_v33 = vpop.f32.mrf.mxu1 }
 0x322   :  { %v157_v51 = vsel %vm156_vm8, %v1992_v32, %v153_v48  ;;  %v331_v5 = vpop.f32.mrf.mxu2  ;;  %v351_v8 = vpop.f32.mrf.mxu3 }
 0x323   :  { %v162_v52 = vsel %vm159_vm10, %v161_v50, %v157_v51  ;;  %v2440_v56 = vadd.f32 %v477_v7, %v331_v5  ;;  %v2442_v42 = vadd.f32 %v497_v9, %v351_v8 }
 0x324   :  { %v163_v54 = vmul.f32 %v162_v52, %v2167_v49 }
 0x326   :  { %v164_v59 = vmul.f32 %v163_v54, %v2167_v49  ;;  %1791 = vst.msk [vmem:[#allocation4] sm:$0x1] %vm122_vm9, %v163_v54  ;;  %v1617_v49 = vpop.permute.xlu0 %1616 }
 0x327   :  { %v1624_v0 = vsel %vm1618_vm5, %v1615_v57, %v1617_v49  ;;  %1814 = dma.vmem_to_hbm [thread:$0]  %s1810_s18, 16, %s1812_s21, [#allocation5]  }
 0x328   :  { %v165_v63 = vsel %vm122_vm9, %v164_v59, 0.0  ;;  %1957 = vmatpush.msk.msrb.mxu1 %vm241_vm11, %v1624_v0  ;;  %1825 = dma.vmem_to_hbm [thread:$0]  %s1821_s22, 16, %s1823_s25, [#allocation5]  }
 0x329   :  { %166 = vadd.xlane.f32.xlu2 %v165_v63  ;;  %1958 = vmatmul.msk.f32.vlgmr.msrb.gmra.mxu1 %vm237_vm12, %v1946_v46 }
 0x32a   :  { %v437_v10 = vpop.f32.mrf.mxu2  ;;  %v457_v44 = vpop.f32.mrf.mxu3 }
 0x32b   :  { %v438_v11 = vadd.f32 %v437_v10, %v291_v3  ;;  %v2446_v13 = vadd.f32 %v457_v44, %v311_v1 }
 0x32d   :  { %v2444_v12 = vadd.f32 %v609_v43, %v438_v11 }
 0x332   :  { %v517_v14 = vpop.f32.mrf.mxu2  ;;  %v589_v15 = vpop.f32.mrf.mxu3 }
 0x333   :  { %v2448_v55 = vadd.f32 %v517_v14, %v371_v2  ;;  %v2450_v16 = vadd.f32 %v589_v15, %v418_v6  ;;  %v694_v6 = vadd.f32 %v629_v26, %v2446_v13 }
 0x334   :  { %v767_v30 = vpop.f32.mrf.mxu0 }
 0x335   :  { %v697_v9 = vadd.f32 %v689_v29, %v2448_v55  ;;  %v870_v14 = vadd.f32 %v767_v30, %v2450_v16 }
 0x33a   :  { %v649_v27 = vpop.f32.mrf.mxu2 }
 0x33b   :  { %v669_v28 = vpop.f32.mrf.mxu3  ;;  %v695_v7 = vadd.f32 %v649_v27, %v2440_v56 }
 0x33c   :  { %v847_v34 = vpop.f32.mrf.mxu0  ;;  %v696_v8 = vadd.f32 %v669_v28, %v2442_v42 }
 0x33d   :  { %v873_v18 = vadd.f32 %v827_v33, %v695_v7 }
 0x342   :  { %v787_v31 = vpop.f32.mrf.mxu2 }
 0x343   :  { %v807_v32 = vpop.f32.mrf.mxu3  ;;  %v871_v15 = vadd.f32 %v787_v31, %v2444_v12 }
 0x344   :  { %v965_v39 = vpop.f32.mrf.mxu1  ;;  %v872_v17 = vadd.f32 %v807_v32, %v694_v6 }
 0x345   :  { %v985_v45 = vpop.f32.mrf.mxu0  ;;  %v1049_v13 = vadd.f32 %v965_v39, %v871_v15 }
 0x34a   :  { %v867_v37 = vpop.f32.mrf.mxu2 }
 0x34b   :  { %v945_v38 = vpop.f32.mrf.mxu3 }
 0x34c   :  { %v1045_v47 = vpop.f32.mrf.mxu1 }
 0x34d   :  { %v1123_v54 = vpop.f32.mrf.mxu0 }
 0x352   :  { %v1005_v46 = vpop.f32.mrf.mxu2 }
 0x353   :  { %v1025_v36 = vpop.f32.mrf.mxu3  ;;  %v1051_v56 = vadd.f32 %v1005_v46, %v873_v18 }
 0x35a   :  { %v1143_v57 = vpop.f32.mrf.mxu2 }
 0x35b   :  { %v1163_v59 = vpop.f32.mrf.mxu3  ;;  %v1227_v26 = vadd.f32 %v1143_v57, %v1049_v13 }
 0x35c   :  { %v1183_v60 = vpop.f32.mrf.mxu1 }
 0x35d   :  { %v1203_v49 = vpop.f32.mrf.mxu0  ;;  %v1229_v28 = vadd.f32 %v1183_v60, %v1051_v56 }
 0x362   :  { %v1223_v0 = vpop.f32.mrf.mxu2 }
 0x364   :  { %v1321_v2 = vpop.f32.mrf.mxu1 }
 0x365   :  { %v1405_v32 = vadd.f32 %v1321_v2, %v1227_v26 }
 0x36a   :  { %v1301_v1 = vpop.f32.mrf.mxu3 }
 0x36d   :  { %v1341_v41 = vpop.f32.mrf.mxu0 }
 0x372   :  { %v1361_v3 = vpop.f32.mrf.mxu2  ;;  %v1381_v4 = vpop.f32.mrf.mxu3 }
 0x374   :  { %v1401_v5 = vpop.f32.mrf.mxu1 }
 0x375   :  { %v1479_v10 = vpop.f32.mrf.mxu0 }
 0x37a   :  { %v1499_v11 = vpop.f32.mrf.mxu2 }
 0x37c   :  { %v1539_v44 = vpop.f32.mrf.mxu1 }
 0x382   :  { %v1519_v43 = vpop.f32.mrf.mxu3 }
 0x38a   :  { %v1579_v55 = vpop.f32.mrf.mxu2 }
 0x38c   :  { %v1677_v16 = vpop.f32.mrf.mxu1 }
 0x392   :  { %v1657_v29 = vpop.f32.mrf.mxu3 }
 0x39c   :  { %v167_v19 = vpop.xlane.xlu2 %166 }
 0x39d   :  { %v168_v20 = vrot.slane %v167_v19, 4 }
 0x39f   :  { %v169_v21 = vadd.f32 %v168_v20, %v167_v19  ;;  %v874_v19 = vadd.f32 %v847_v34, %v696_v8  ;;  %v875_v20 = vadd.f32 %v867_v37, %v697_v9  ;;  %v1407_v34 = vadd.f32 %v1361_v3, %v1229_v28 }
 0x3a1   :  { %v170_v22 = vrot.slane %v169_v21, 2  ;;  %v1053_v42 = vadd.f32 %v1045_v47, %v875_v20  ;;  %v1585_v46 = vadd.f32 %v1539_v44, %v1407_v34 }
 0x3a3   :  { %v171_v23 = vadd.f32 %v170_v22, %v169_v21  ;;  %v1048_v21 = vadd.f32 %v945_v38, %v870_v14  ;;  %v1050_v22 = vadd.f32 %v985_v45, %v872_v17  ;;  %v1231_v12 = vadd.f32 %v1223_v0, %v1053_v42 }
 0x3a5   :  { %v172_v24 = vrot.slane %v171_v23, 1  ;;  %v1228_v27 = vadd.f32 %v1163_v59, %v1050_v22  ;;  %v1409_v38 = vadd.f32 %v1401_v5, %v1231_v12 }
 0x3a7   :  { %v173_v25 = vadd.f32 %v172_v24, %v171_v23  ;;  %v1052_v23 = vadd.f32 %v1025_v36, %v874_v19  ;;  %v1559_v24 = vpop.f32.mrf.mxu0  ;;  %v1406_v33 = vadd.f32 %v1341_v41, %v1228_v27  ;;  %v1587_v47 = vadd.f32 %v1579_v55, %v1409_v38 }
 0x3a9   :  { %1967 = vpush %v173_v25  ;;  %v1226_v25 = vadd.f32 %v1123_v54, %v1048_v21  ;;  %v1230_v30 = vadd.f32 %v1203_v49, %v1052_v23  ;;  %v1584_v45 = vadd.f32 %v1519_v43, %v1406_v33 }
 0x3ab   :  { %v1404_v31 = vadd.f32 %v1301_v1, %v1226_v25  ;;  %v1408_v37 = vadd.f32 %v1381_v4, %v1230_v30 }
 0x3ad   :  { %v1582_v39 = vadd.f32 %v1479_v10, %v1404_v31  ;;  %v1586_v36 = vadd.f32 %v1559_v24, %v1408_v37 }
 0x3da   :  { %s1968_s6 = spop %1967 }
 0x3db   :  { %v175_v40 = vstv %s1968_s6 }
 0x3dc   :  { %1993 = vrcp.f32 %v175_v40  ;;  %v187_v51 = vand.u32 2147483648, %v175_v40  ;;  %v185_v53 = vand.u32 2147483647, %v175_v40  ;;  %vm181_vm11 = vweird.f32 %v175_v40 }
 0x3de   :  { %v188_v61 = vor.u32 1.1754944e-38, %v187_v51  ;;  %vm186_vm13 = vcmp.eq.f32.partialorder %v185_v53, 8.507059e+37  ;;  %v1757_v51 = vpop.f32.mrf.mxu1 }
 0x3df   :  { %v1765_v59 = vadd.f32 %v1757_v51, %v1587_v47 }
 0x3e2   :  { %v1994_v35 = vpop.eup %1993 }
 0x3e3   :  { %v177_v48 = vmul.f32 %v1994_v35, %v175_v40  ;;  %vm182_vm9 = vweird.f32 %v1994_v35  ;;  %v1583_v40 = vadd.f32 %v1499_v11, %v1405_v32 }
 0x3e4   :  { %vm183_vm12 = vmor %vm181_vm11, %vm182_vm9 }
 0x3e5   :  { %v178_v50 = vsub.f32 1.0, %v177_v48  ;;  %v1717_v48 = vpop.f32.mrf.mxu2  ;;  %v1761_v53 = vadd.f32 %v1677_v16, %v1583_v40 }
 0x3e6   :  { %v1763_v57 = vadd.f32 %v1717_v48, %v1585_v46 }
 0x3e7   :  { %v179_v52 = vmul.f32 %v1994_v35, %v178_v50  ;;  %v1737_v50 = vpop.f32.mrf.mxu3 }
 0x3e9   :  { %v180_v58 = vadd.f32 %v1994_v35, %v179_v52  ;;  %v1760_v52 = vadd.f32 %v1657_v29, %v1582_v39 }
 0x3eb   :  { %v184_v62 = vsel %vm183_vm12, %v1994_v35, %v180_v58  ;;  %v1697_v35 = vpop.f32.mrf.mxu0  ;;  %v1764_v58 = vadd.f32 %v1737_v50, %v1586_v36 }
 0x3ec   :  { %v189_v63 = vsel %vm186_vm13, %v188_v61, %v184_v62  ;;  %v1762_v54 = vadd.f32 %v1697_v35, %v1584_v45  ;;  %v1777_v61 = vpop.permute.xlu1 %1776 }
 0x3ed   :  { %1969 = vpush %v189_v63 }
 0x41e   :  { %s1970_s7 = spop %1969 }
 0x41f   :  { %v1766_v60 = vstv %s1970_s7 }
 0x420   :  { %v1767_v62 = vmul.f32 %v1766_v60, %v1760_v52  ;;  %v1768_v63 = vmul.f32 %v1766_v60, %v1761_v53  ;;  %v1769_v49 = vmul.f32 %v1766_v60, %v1762_v54  ;;  %v1770_v0 = vmul.f32 %v1766_v60, %v1763_v57 }
 0x421   :  { %v1771_v1 = vmul.f32 %v1766_v60, %v1764_v58  ;;  %v1772_v2 = vmul.f32 %v1766_v60, %v1765_v59 }
 0x422   :  { %v1779_v41 = vadd.f32 %v1777_v61, %v1767_v62  ;;  %v1780_v3 = vadd.f32 %v1777_v61, %v1768_v63  ;;  %v1781_v4 = vadd.f32 %v1777_v61, %v1769_v49  ;;  %v1782_v5 = vadd.f32 %v1777_v61, %v1770_v0 }
 0x423   :  { %v1783_v6 = vadd.f32 %v1777_v61, %v1771_v1  ;;  %v1784_v7 = vadd.f32 %v1777_v61, %v1772_v2 }
 0x424   :  { %1785 = vst [vmem:[#allocation2] sm:$0xff] %v1779_v41 }
 0x425   :  { %1786 = vst [vmem:[#allocation2 + $0x8] sm:$0xff] %v1780_v3 }
 0x426   :  { %1787 = vst [vmem:[#allocation2 + $0x10] sm:$0xff] %v1781_v4 }
 0x427   :  { %1788 = vst [vmem:[#allocation2 + $0x18] sm:$0xff] %v1782_v5 }
 0x428   :  { %1789 = vst [vmem:[#allocation2 + $0x20] sm:$0xff] %v1783_v6 }
 0x429   :  { %1790 = vst [vmem:[#allocation2 + $0x28] sm:$0xff] %v1784_v7 }
 0x42a   :  { %1803 = dma.vmem_to_hbm [thread:$0]  %s1799_s27, 768, %s1801_s28, [#allocation3]  }
 0x42b   :  { %2067 = dma.done.wait [#allocation3], 768  }
 0x42c   :  { %2068 = vsyncadd [#allocation3], 4294966528 }
 0x42d   :  { %2069 = dma.done.wait [#allocation5], 32  }
 0x42e   :  { %2070 = vsyncadd [#allocation5], 4294967264 }
 0x42f   :  { %1838 = vsyncpa [#allocation3], 1 }
 0x430   :  { %1839 = vsyncpa [#allocation5], 1 }

</bundles_post_ra>
